<compile_context>
chip_gen: v6e
topology: v6e:2x2x1
jax: 0.10.0
libtpu: 0.0.40
codegen_flags: <defaults>
</compile_context>

<pallas_src>
import functools

import jax
import jax.numpy as jnp
from jax import lax
from jax.experimental import pallas as pl
from jax.experimental.pallas import tpu as pltpu

IN_DIM = 1
HID_DIM = 100
OUT_DIM = 2

HID_PAD = 104        # 100 -> 104 (next multiple of 8; zeros inert through relu/matmul)
MAX_TILE_N = 32768   # big batch tiles to amortize per-grid-step overhead
CHUNK_CANDIDATES = (512, 256, 128)


def _round_up(a, b):
    return ((a + b - 1) // b) * b


def _make_kernel(tile_n, chunk_n):
    n_chunks = tile_n // chunk_n

    def mlp_kernel(x_ref, w1_ref, b1_ref, w2_ref, b2_ref, o_ref):
        # x_ref:  (1, tile_n)      batch on the lane axis
        # w1_ref: (104, 1)         padded FC1 weight column
        # b1_ref: (104, 1)         padded FC1 bias
        # w2_ref: (2, 104)         predict weights
        # b2_ref: (2, 1)           predict bias
        # o_ref:  (2, tile_n)      lane-dense output tile
        w1 = w1_ref[...]
        b1 = b1_ref[...]
        w2 = w2_ref[...]
        b2 = b2_ref[...]

        if n_chunks == 1:
            xs = x_ref[...]                                        # (1, tile_n)
            h = jnp.maximum(w1 * xs + b1, 0.0)                     # (104, tile_n)
            o_ref[...] = jnp.dot(w2, h,
                                 preferred_element_type=jnp.float32) + b2
        else:
            def body(c, carry):
                start = pl.multiple_of(c * chunk_n, chunk_n)
                xs = x_ref[:, pl.ds(start, chunk_n)]               # (1, chunk)
                # Layer 1: Linear(1 -> 104) + ReLU as a VPU broadcast product.
                h = jnp.maximum(w1 * xs + b1, 0.0)                 # (104, chunk)
                # Layer 2: Linear(104 -> 2) on the MXU, lane-dense result.
                out = jnp.dot(w2, h,
                              preferred_element_type=jnp.float32) + b2
                o_ref[:, pl.ds(start, chunk_n)] = out
                return carry

            lax.fori_loop(0, n_chunks, body, 0, unroll=(n_chunks <= 4))

    return mlp_kernel


def _pick_tiles(n):
    """Pick (tile_n, chunk_n): tile_n multiple of 128, >=2 grid steps when
    possible (v7x megacore), capped by MAX_TILE_N; chunk_n divides tile_n."""
    half = _round_up(max((n + 1) // 2, 1), 128)
    tile_n = min(MAX_TILE_N, half)
    chunk_n = next(c for c in CHUNK_CANDIDATES if tile_n % c == 0)
    return tile_n, chunk_n


@functools.partial(jax.jit, static_argnames=())
def _identity(x):   # helper to keep types tidy (not strictly needed)
    return x


def mlp_forward(x, w1, b1, w2, b2):
    """x: (N, 1) float32. Returns (N, 2) float32.

    w1: (100, 1)  b1: (100,)   -- PyTorch Linear layout (out_features, in_features)
    w2: (2, 100)  b2: (2,)
    """
    n = x.shape[0]

    # --- pad parameters once (zeros are inert through ReLU / matmul) ---
    w1p = jnp.zeros((HID_PAD, 1), jnp.float32).at[:HID_DIM, :].set(w1.astype(jnp.float32))
    b1p = jnp.zeros((HID_PAD, 1), jnp.float32).at[:HID_DIM, 0].set(b1.astype(jnp.float32))
    w2p = jnp.zeros((OUT_DIM, HID_PAD), jnp.float32).at[:, :HID_DIM].set(w2.astype(jnp.float32))
    b2p = b2.astype(jnp.float32).reshape(OUT_DIM, 1)

    # --- batch tiling: N on the lane axis ---
    tile_n, chunk_n = _pick_tiles(n)
    n_pad = _round_up(n, tile_n)

    x_flat = x.astype(jnp.float32).reshape(1, n)           # free reshape of (N,1)
    xt = x_flat if n_pad == n else jnp.pad(x_flat, ((0, 0), (0, n_pad - n)))

    grid = (n_pad // tile_n,)

    out_t = pl.pallas_call(
        _make_kernel(tile_n, chunk_n),
        out_shape=jax.ShapeDtypeStruct((OUT_DIM, n_pad), jnp.float32),
        grid=grid,
        in_specs=[
            pl.BlockSpec((1, tile_n), lambda i: (0, i)),           # x, streamed
            pl.BlockSpec((HID_PAD, 1), lambda i: (0, 0)),          # w1, resident
            pl.BlockSpec((HID_PAD, 1), lambda i: (0, 0)),          # b1, resident
            pl.BlockSpec((OUT_DIM, HID_PAD), lambda i: (0, 0)),    # w2, resident
            pl.BlockSpec((OUT_DIM, 1), lambda i: (0, 0)),          # b2, resident
        ],
        out_specs=pl.BlockSpec((OUT_DIM, tile_n), lambda i: (0, i)),
        compiler_params=pltpu.CompilerParams(
            dimension_semantics=("parallel",)),                    # megacore on v7x
    )(xt, w1p, b1p, w2p, b2p)

    # un-transpose + drop batch padding in the wrapper
    return out_t[:, :n].T                                          # (N, 2)


if __name__ == "__main__":
    key = jax.random.PRNGKey(0)
    k_x, k_w1, k_b1, k_w2, k_b2 = jax.random.split(key, 5)

    # PyTorch-Linear-style parameter init (deterministic).
    w1 = jax.random.uniform(k_w1, (HID_DIM, IN_DIM), jnp.float32, -1.0, 1.0)
    b1 = jax.random.uniform(k_b1, (HID_DIM,), jnp.float32, -1.0, 1.0)
    bound2 = 1.0 / jnp.sqrt(HID_DIM)
    w2 = jax.random.uniform(k_w2, (OUT_DIM, HID_DIM), jnp.float32, -bound2, bound2)
    b2 = jax.random.uniform(k_b2, (OUT_DIM,), jnp.float32, -bound2, bound2)

    ok = True
    # small batch (single chunk), mid batch (multi-tile + chunked loop),
    # larger batch (chunk=512 path, 2-step grid)
    for n in (8, 1300, 5000):
        kx = jax.random.fold_in(k_x, n)
        x = jax.random.normal(kx, (n, IN_DIM), dtype=jnp.float32)

        out = mlp_forward(x, w1, b1, w2, b2)
        out = jax.block_until_ready(out)

        # Pure-JAX reference check
        ref = jnp.maximum(x @ w1.T + b1, 0.0) @ w2.T + b2
        ok = ok and (out.shape == (n, OUT_DIM))
        ok = ok and bool(jnp.allclose(out, ref, atol=1e-5, rtol=1e-5))

    assert ok, "mismatch vs reference"
    print("KERNEL_OK")
</pallas_src>

<mosaic_0001>
module attributes {stable_mosaic.version = 11 : i64} {
  func.func @mlp_kernel(%arg0: i32, %arg1: memref<1x128xf32, #tpu.memory_space<vmem>>, %arg2: memref<104x1xf32, #tpu.memory_space<vmem>>, %arg3: memref<104x1xf32, #tpu.memory_space<vmem>>, %arg4: memref<2x104xf32, #tpu.memory_space<vmem>>, %arg5: memref<2x1xf32, #tpu.memory_space<vmem>>, %arg6: memref<2x128xf32, #tpu.memory_space<vmem>>) attributes {dimension_semantics = [#tpu.dimension_semantics<parallel>], iteration_bounds = array<i64: 1>, scalar_prefetch = 0 : i64, scratch_operands = 0 : i64, tpu.core_type = #tpu.core_type<tc>, window_params = [{transform_indices = @transform_0, window_bounds = array<i64: 1, 128>}, {pipeline_mode = #tpu.pipeline_mode<synchronous>, transform_indices = @transform_1, window_bounds = array<i64: 104, 1>}, {pipeline_mode = #tpu.pipeline_mode<synchronous>, transform_indices = @transform_2, window_bounds = array<i64: 104, 1>}, {pipeline_mode = #tpu.pipeline_mode<synchronous>, transform_indices = @transform_3, window_bounds = array<i64: 2, 104>}, {pipeline_mode = #tpu.pipeline_mode<synchronous>, transform_indices = @transform_4, window_bounds = array<i64: 2, 1>}, {transform_indices = @transform_5, window_bounds = array<i64: 2, 128>}]} {
    %c0 = arith.constant 0 : index
    %c0_0 = arith.constant 0 : index
    %0 = vector.load %arg2[%c0, %c0_0] : memref<104x1xf32, #tpu.memory_space<vmem>>, vector<104x1xf32>
    %c0_1 = arith.constant 0 : index
    %c0_2 = arith.constant 0 : index
    %1 = vector.load %arg3[%c0_1, %c0_2] : memref<104x1xf32, #tpu.memory_space<vmem>>, vector<104x1xf32>
    %c0_3 = arith.constant 0 : index
    %c0_4 = arith.constant 0 : index
    %2 = vector.load %arg4[%c0_3, %c0_4] : memref<2x104xf32, #tpu.memory_space<vmem>>, vector<2x104xf32>
    %c0_5 = arith.constant 0 : index
    %c0_6 = arith.constant 0 : index
    %3 = vector.load %arg5[%c0_5, %c0_6] : memref<2x1xf32, #tpu.memory_space<vmem>>, vector<2x1xf32>
    %c0_7 = arith.constant 0 : index
    %c0_8 = arith.constant 0 : index
    %4 = vector.load %arg1[%c0_7, %c0_8] : memref<1x128xf32, #tpu.memory_space<vmem>>, vector<1x128xf32>
    %5 = vector.broadcast %0 : vector<104x1xf32> to vector<104x128xf32>
    %6 = vector.broadcast %4 : vector<1x128xf32> to vector<104x128xf32>
    %7 = arith.mulf %5, %6 : vector<104x128xf32>
    %8 = vector.broadcast %1 : vector<104x1xf32> to vector<104x128xf32>
    %9 = arith.addf %7, %8 : vector<104x128xf32>
    %cst = arith.constant 0.000000e+00 : f32
    %10 = vector.broadcast %cst : f32 to vector<104x128xf32>
    %11 = arith.maximumf %9, %10 : vector<104x128xf32>
    %cst_9 = arith.constant dense<0.000000e+00> : vector<2x128xf32>
    %12 = tpu.matmul %2, %11, %cst_9 {dimension_numbers = #tpu.dot_dimension_numbers<[1], [0], [0], [1], [0, 0, 1, 1], [], []>} : vector<2x104xf32>, vector<104x128xf32>, vector<2x128xf32> -> vector<2x128xf32>
    %13 = vector.broadcast %3 : vector<2x1xf32> to vector<2x128xf32>
    %14 = arith.addf %12, %13 : vector<2x128xf32>
    %c0_10 = arith.constant 0 : index
    %c0_11 = arith.constant 0 : index
    %15 = vector.load %arg6[%c0_10, %c0_11] : memref<2x128xf32, #tpu.memory_space<vmem>>, vector<2x128xf32>
    tpu.vector_store %arg6[%c0_10, %c0_11], %14 {strides = array<i32>} : memref<2x128xf32, #tpu.memory_space<vmem>>, vector<2x128xf32>,
    return
  }
  func.func @transform_0(%arg0: i32) -> (i32, i32) {
    %c0_i32 = arith.constant 0 : i32
    %c0_i32_0 = arith.constant 0 : i32
    return %c0_i32, %arg0 : i32, i32
  }
  func.func @transform_1(%arg0: i32) -> (i32, i32) {
    %c0_i32 = arith.constant 0 : i32
    %c0_i32_0 = arith.constant 0 : i32
    %c0_i32_1 = arith.constant 0 : i32
    return %c0_i32, %c0_i32_0 : i32, i32
  }
  func.func @transform_2(%arg0: i32) -> (i32, i32) {
    %c0_i32 = arith.constant 0 : i32
    %c0_i32_0 = arith.constant 0 : i32
    %c0_i32_1 = arith.constant 0 : i32
    return %c0_i32, %c0_i32_0 : i32, i32
  }
  func.func @transform_3(%arg0: i32) -> (i32, i32) {
    %c0_i32 = arith.constant 0 : i32
    %c0_i32_0 = arith.constant 0 : i32
    %c0_i32_1 = arith.constant 0 : i32
    return %c0_i32, %c0_i32_0 : i32, i32
  }
  func.func @transform_4(%arg0: i32) -> (i32, i32) {
    %c0_i32 = arith.constant 0 : i32
    %c0_i32_0 = arith.constant 0 : i32
    %c0_i32_1 = arith.constant 0 : i32
    return %c0_i32, %c0_i32_0 : i32, i32
  }
  func.func @transform_5(%arg0: i32) -> (i32, i32) {
    %c0_i32 = arith.constant 0 : i32
    %c0_i32_0 = arith.constant 0 : i32
    return %c0_i32, %arg0 : i32, i32
  }
}

</mosaic_0001>

<bundles_post_ra>
// kernel: tpu_custom_call.1
= control target key start
LH: loop header
LB: loop body
LE: loop exit
PB: predicated region body
PF: predicated region fallthrough
CT: control target
= control target key end

     0   :  { %v392_v2 = vmov 0   ;;  %v393_v5 = vmov 0.0   ;;  %s545_s0 = inlined_call_operand.vmem [shape: f32[1,128], index: 0, kind: input, shape index: {}]   ;;  %s546_s1 = inlined_call_operand.vmem [shape: f32[104,1], index: 1, kind: input, shape index: {}]   ;;  %s547_s2 = inlined_call_operand.vmem [shape: f32[104,1], index: 2, kind: input, shape index: {}]   ;;  %s548_s3 = inlined_call_operand.vmem [shape: f32[2,104], index: 3, kind: input, shape index: {}]   ;;  %s549_s4 = inlined_call_operand.vmem [shape: f32[2,1], index: 4, kind: input, shape index: {}]   ;;  %s550_s5 = inlined_call_operand.hbm [shape: f32[2,128], index: 5, kind: output, shape index: {}]  }
   0x1   :  { %v46_v0 = vld [vmem:[%s547_s2 + $0x60] sm:$0xff]  ;;  %369 = vset.pattern.permute.xlu1 %v392_v2  ;;  %368 = vset.pattern.permute.xlu0 %v392_v2  ;;  %v32_v3 = vld [vmem:[%s546_s1 + $0x58] sm:$0xff]  ;;  %v31_v4 = vld [vmem:[%s546_s1 + $0x50] sm:$0xff] }
   0x2   :  { %v33_v1 = vld [vmem:[%s546_s1 + $0x60] sm:$0xff]  ;;  %196 = vperm.xlu1 %369, %v46_v0   ;;  %335 = vmatprep.subr.mxu0 %v393_v5  ;;  %v45_v6 = vld [vmem:[%s547_s2 + $0x58] sm:$0xff]  ;;  %v30_v7 = vld [vmem:[%s546_s1 + $0x48] sm:$0xff] }
   0x3   :  { %112 = vperm.xlu0 %368, %v33_v1  }
   0x6   :  { %102 = vperm.xlu1 %369, %v31_v4  }
   0x7   :  { %107 = vperm.xlu0 %368, %v32_v3  }
   0x8   :  { %10 = vsyncpa [#allocation3], 0  ;;  %v44_v8 = vld [vmem:[%s547_s2 + $0x50] sm:$0xff]  ;;  %v29_v9 = vld [vmem:[%s546_s1 + $0x40] sm:$0xff]  ;;  %vm394_vm0 = vmmov 0   ;;  %vm230_vm1 = vcmask 850944  }
   0x9   :  { %v43_v10 = vld [vmem:[%s547_s2 + $0x48] sm:$0xff]  ;;  %v28_v11 = vld [vmem:[%s546_s1 + $0x38] sm:$0xff]  ;;  %v42_v12 = vld [vmem:[%s547_s2 + $0x40] sm:$0xff]  ;;  %361 = vmatprep.mubr.msk.f32.mxu0 %vm394_vm0, %v393_v5 }
   0xa   :  { %97 = vperm.xlu1 %369, %v30_v7   ;;  %v27_v13 = vld [vmem:[%s546_s1 + $0x30] sm:$0xff]  ;;  %v41_v14 = vld [vmem:[%s547_s2 + $0x38] sm:$0xff]  ;;  %v26_v15 = vld [vmem:[%s546_s1 + $0x28] sm:$0xff] }
   0xb   :  { %191 = vperm.xlu0 %368, %v45_v6   ;;  %v40_v16 = vld [vmem:[%s547_s2 + $0x30] sm:$0xff]  ;;  %v25_v17 = vld [vmem:[%s546_s1 + $0x20] sm:$0xff]  ;;  %v39_v18 = vld [vmem:[%s547_s2 + $0x28] sm:$0xff] }
   0xc   :  { %v24_v19 = vld [vmem:[%s546_s1 + $0x18] sm:$0xff]  ;;  %v38_v20 = vld [vmem:[%s547_s2 + $0x20] sm:$0xff]  ;;  %v23_v21 = vld [vmem:[%s546_s1 + $0x10] sm:$0xff] }
   0xd   :  { %v37_v22 = vld [vmem:[%s547_s2 + $0x18] sm:$0xff]  ;;  %v22_v23 = vld [vmem:[%s546_s1 + $0x8] sm:$0xff]  ;;  %v36_v24 = vld [vmem:[%s547_s2 + $0x10] sm:$0xff] }
   0xe   :  { %92 = vperm.xlu1 %369, %v29_v9   ;;  %v21_v25 = vld [vmem:[%s546_s1] sm:$0xff]  ;;  %v35_v26 = vld [vmem:[%s547_s2 + $0x8] sm:$0xff] }
   0xf   :  { %186 = vperm.xlu0 %368, %v44_v8   ;;  %v34_v27 = vld [vmem:[%s547_s2] sm:$0xff] }
  0x10   :  { %v48_v28 = vld [vmem:[%s549_s4] sm:$0x3]  ;;  %s395_s4 = smov [#allocation2]  }
  0x11   :  { %v512_v29 = vld [vmem:[%s545_s0] ss:$0 sm:$0xff]  ;;  %s311_s23 = sshll.u32 %s395_s4, 4  ;;  %s312_s23 = int_to_ptr.vmem [resolvable:$true] %s311_s23 }
  0x12   :  { %87 = vperm.xlu1 %369, %v28_v11   ;;  %s370_s24 = scalar_lea.vmem %s312_s23, 32  ;;  %p375_p1 = scmp.lt.s32.totalorder %s312_s23, %s312_s23 }
  0x13   :  { %181 = vperm.xlu0 %368, %v43_v10   ;;  %p371_p0 = scmp.ne.s32.totalorder %s312_s23, %s370_s24  ;;  %p376_p2 = scmp.lt.s32.totalorder %s370_s24, %s370_s24 }
  0x15   :  { %p377_p3 = por %p376_p2, %p375_p1 }
  0x16   :  { %82 = vperm.xlu1 %369, %v27_v13  }
  0x17   :  { %176 = vperm.xlu0 %368, %v42_v12   ;;  %p378_p4 = pnand %p377_p3, %p371_p0 }
  0x1a   :  { %77 = vperm.xlu1 %369, %v26_v15  }
  0x1b   :  { %171 = vperm.xlu0 %368, %v41_v14  }
  0x1e   :  { %72 = vperm.xlu1 %369, %v25_v17  }
  0x1f   :  { %166 = vperm.xlu0 %368, %v40_v16  }
  0x22   :  { %67 = vperm.xlu1 %369, %v24_v19  }
  0x23   :  { %161 = vperm.xlu0 %368, %v39_v18  }
  0x26   :  { %62 = vperm.xlu1 %369, %v23_v21  }
  0x27   :  { %156 = vperm.xlu0 %368, %v38_v20  }
  0x2a   :  { %57 = vperm.xlu1 %369, %v22_v23  }
  0x2b   :  { %151 = vperm.xlu0 %368, %v37_v22  }
  0x2e   :  { %52 = vperm.xlu1 %369, %v21_v25  }
  0x2f   :  { %146 = vperm.xlu0 %368, %v36_v24  }
  0x32   :  { %136 = vperm.xlu1 %369, %v34_v27  }
  0x33   :  { %141 = vperm.xlu0 %368, %v35_v26  }
  0x37   :  { %227 = vperm.xlu0 %368, %v48_v28  }
  0x7d   :  { %v197_v30 = vpop.permute.xlu1 %196 }
  0x7e   :  { %v113_v31 = vpop.permute.xlu0 %112 }
  0x7f   :  { %v133_v32 = vmul.f32 %v512_v29, %v113_v31 }
  0x81   :  { %v211_v33 = vadd.f32 %v197_v30, %v133_v32  ;;  %v103_v35 = vpop.permute.xlu1 %102 }
  0x82   :  { %v108_v34 = vpop.permute.xlu0 %107  ;;  %v131_v41 = vmul.f32 %v512_v29, %v103_v35 }
  0x83   :  { %v224_v36 = vmax.f32 %v211_v33, 0.0  ;;  %v132_v37 = vmul.f32 %v512_v29, %v108_v34  ;;  %v47_v33 = vld [vmem:[%s548_s3] sm:$0x3] }
  0x85   :  { %336 = vmatpush3.msra.mxu0 %v224_v36  ;;  %v98_v39 = vpop.permute.xlu1 %97 }
  0x86   :  { %v192_v38 = vpop.permute.xlu0 %191  ;;  %337 = vmatprep.subr.mxu0 %v393_v5  ;;  %v130_v46 = vmul.f32 %v512_v29, %v98_v39 }
  0x87   :  { %v210_v40 = vadd.f32 %v192_v38, %v132_v37 }
  0x89   :  { %v223_v42 = vmax.f32 %v210_v40, 0.0  ;;  %v93_v44 = vpop.permute.xlu1 %92 }
  0x8a   :  { %v187_v43 = vpop.permute.xlu0 %186  ;;  %v129_v51 = vmul.f32 %v512_v29, %v93_v44 }
  0x8b   :  { %v209_v45 = vadd.f32 %v187_v43, %v131_v41  ;;  %338 = vmatpush3.msra.mxu0 %v223_v42 }
  0x8c   :  { %339 = vmatprep.subr.mxu0 %v393_v5 }
  0x8d   :  { %v222_v47 = vmax.f32 %v209_v45, 0.0  ;;  %v88_v49 = vpop.permute.xlu1 %87 }
  0x8e   :  { %v182_v48 = vpop.permute.xlu0 %181  ;;  %v128_v56 = vmul.f32 %v512_v29, %v88_v49 }
  0x8f   :  { %v208_v50 = vadd.f32 %v182_v48, %v130_v46  ;;  %340 = vmatpush3.msra.mxu0 %v222_v47 }
  0x90   :  { %341 = vmatprep.subr.mxu0 %v393_v5 }
  0x91   :  { %v221_v52 = vmax.f32 %v208_v50, 0.0  ;;  %v83_v54 = vpop.permute.xlu1 %82 }
  0x92   :  { %v177_v53 = vpop.permute.xlu0 %176  ;;  %v127_v61 = vmul.f32 %v512_v29, %v83_v54 }
  0x93   :  { %v207_v55 = vadd.f32 %v177_v53, %v129_v51  ;;  %342 = vmatpush3.msra.mxu0 %v221_v52 }
  0x94   :  { %343 = vmatprep.subr.mxu0 %v393_v5 }
  0x95   :  { %v220_v57 = vmax.f32 %v207_v55, 0.0  ;;  %v78_v59 = vpop.permute.xlu1 %77 }
  0x96   :  { %v172_v58 = vpop.permute.xlu0 %171  ;;  %v126_v2 = vmul.f32 %v512_v29, %v78_v59 }
  0x97   :  { %v206_v60 = vadd.f32 %v172_v58, %v128_v56  ;;  %344 = vmatpush3.msra.mxu0 %v220_v57 }
  0x98   :  { %345 = vmatprep.subr.mxu0 %v393_v5 }
  0x99   :  { %v219_v62 = vmax.f32 %v206_v60, 0.0  ;;  %v73_v0 = vpop.permute.xlu1 %72 }
  0x9a   :  { %v167_v63 = vpop.permute.xlu0 %166  ;;  %v125_v8 = vmul.f32 %v512_v29, %v73_v0 }
  0x9b   :  { %v205_v1 = vadd.f32 %v167_v63, %v127_v61  ;;  %346 = vmatpush3.msra.mxu0 %v219_v62 }
  0x9c   :  { %347 = vmatprep.subr.mxu0 %v393_v5 }
  0x9d   :  { %v218_v3 = vmax.f32 %v205_v1, 0.0  ;;  %v68_v6 = vpop.permute.xlu1 %67 }
  0x9e   :  { %v162_v4 = vpop.permute.xlu0 %161  ;;  %v124_v13 = vmul.f32 %v512_v29, %v68_v6 }
  0x9f   :  { %v204_v7 = vadd.f32 %v162_v4, %v126_v2  ;;  %348 = vmatpush3.msra.mxu0 %v218_v3 }
  0xa0   :  { %349 = vmatprep.subr.mxu0 %v393_v5 }
  0xa1   :  { %v217_v9 = vmax.f32 %v204_v7, 0.0  ;;  %v63_v11 = vpop.permute.xlu1 %62 }
  0xa2   :  { %v157_v10 = vpop.permute.xlu0 %156  ;;  %v123_v18 = vmul.f32 %v512_v29, %v63_v11 }
  0xa3   :  { %v203_v12 = vadd.f32 %v157_v10, %v125_v8  ;;  %350 = vmatpush3.msra.mxu0 %v217_v9 }
  0xa4   :  { %351 = vmatprep.subr.mxu0 %v393_v5 }
  0xa5   :  { %v216_v14 = vmax.f32 %v203_v12, 0.0  ;;  %v58_v16 = vpop.permute.xlu1 %57 }
  0xa6   :  { %v152_v15 = vpop.permute.xlu0 %151  ;;  %v122_v23 = vmul.f32 %v512_v29, %v58_v16 }
  0xa7   :  { %v202_v17 = vadd.f32 %v152_v15, %v124_v13  ;;  %352 = vmatpush3.msra.mxu0 %v216_v14 }
  0xa8   :  { %353 = vmatprep.subr.mxu0 %v393_v5 }
  0xa9   :  { %v215_v19 = vmax.f32 %v202_v17, 0.0  ;;  %v53_v21 = vpop.permute.xlu1 %52 }
  0xaa   :  { %v147_v20 = vpop.permute.xlu0 %146  ;;  %v121_v25 = vmul.f32 %v512_v29, %v53_v21 }
  0xab   :  { %v201_v22 = vadd.f32 %v147_v20, %v123_v18  ;;  %354 = vmatpush3.msra.mxu0 %v215_v19 }
  0xac   :  { %355 = vmatprep.subr.mxu0 %v393_v5 }
  0xad   :  { %v214_v24 = vmax.f32 %v201_v22, 0.0  ;;  %v137_v27 = vpop.permute.xlu1 %136 }
  0xae   :  { %v142_v26 = vpop.permute.xlu0 %141  ;;  %v199_v30 = vadd.f32 %v137_v27, %v121_v25 }
  0xaf   :  { %v200_v28 = vadd.f32 %v142_v26, %v122_v23  ;;  %356 = vmatpush3.msra.mxu0 %v214_v24 }
  0xb0   :  { %357 = vmatprep.subr.mxu0 %v393_v5  ;;  %v212_v32 = vmax.f32 %v199_v30, 0.0 }
  0xb1   :  { %v213_v31 = vmax.f32 %v200_v28, 0.0 }
  0xb2   :  { %v228_v29 = vpop.permute.xlu0 %227 }
  0xb3   :  { %358 = vmatpush3.msra.mxu0 %v213_v31 }
  0xb4   :  { %359 = vmatprep.subr.mxu0 %v393_v5 }
  0xb5   :  { %360 = vmatpush3.msra.mxu0 %v212_v32 }
  0xb6   :  { %362 = vmatmul.mubr.msk.f32.vlgmr.msra.gmra.mxu0 %vm230_vm1, %v47_v33 }
 0x176   :  { %v300_v34 = vpop.f32.mrf.mxu0 }
 0x177   :  { %v301_v35 = vadd.f32 %v300_v34, %v228_v29 }
 0x178   :  { %v363_v36 = vpop.f32.mrf.mxu0 }
 0x179   :  { %304 = vst [vmem:[#allocation2] sm:$0x3] %v301_v35 }
 0x17a   :  { %381 = shalt.err (!%p378_p4)
}
 0x17b   :  { %314 = dma.vmem_to_hbm [thread:$0]  %s312_s23, 32, %s550_s5, [#allocation3]  }
 0x17c   :  { %390 = dma.done.wait [#allocation3], 32  }
 0x17d   :  { %391 = vsyncadd [#allocation3], 4294967264 }
 0x17e   :  { %318 = vsyncpa [#allocation3], 1 }

</bundles_post_ra>
